<compile_context>
chip_gen: v6e
topology: v6e:2x2x1
jax: 0.10.0
libtpu: 0.0.40
codegen_flags: <defaults>
</compile_context>

<pallas_src>
import math

import jax
import jax.numpy as jnp
from jax.experimental import pallas as pl
from jax.experimental.pallas import tpu as pltpu


def _round_up(a, m):
    return -(-a // m) * m


def _sublane(dtype):
    # Second-to-last-dim physical tile for a dtype (f32: 8, bf16: 16, int8: 32).
    return max(8, 8 * (4 // jnp.dtype(dtype).itemsize))


def _tile_bytes(rows, cols, dtype):
    # Physical VMEM footprint of a (rows, cols) buffer incl. tiled-layout padding.
    return (_round_up(rows, _sublane(dtype)) * _round_up(cols, 128)
            * jnp.dtype(dtype).itemsize)


def _divisors(n):
    ds = set()
    i = 1
    while i * i <= n:
        if n % i == 0:
            ds.add(i)
            ds.add(n // i)
        i += 1
    return sorted(ds)


def _token_embedding_kernel(x_ref, w_ref, o_ref):
    # x_ref: (TR, 3C) im2col rows; w_ref: (3C, TN) resident weight tile;
    # o_ref: (TR, TN) output tile.  Pure matmul, f32 accumulation.
    acc = jnp.dot(x_ref[...], w_ref[...], preferred_element_type=jnp.float32)
    o_ref[...] = acc.astype(o_ref.dtype)


def token_embedding(x, weight, *, compute_dtype=None, target_rows=2048,
                    vmem_budget_bytes=24 * 1024 * 1024,
                    vmem_limit_bytes=48 * 1024 * 1024):
    """Circular Conv1d(k=3, no bias) token embedding.

    x: (B, L, C); weight: (D, C, 3) in PyTorch Conv1d layout.
    Returns (B, L, D) in `compute_dtype` (default: x.dtype).
    """
    B, L, C = x.shape
    D = weight.shape[0]
    cdt = jnp.dtype(compute_dtype) if compute_dtype is not None else x.dtype

    # --- circular im2col in the wrapper (layout plumbing; tiny vs. output) ----
    # Output position t uses x[(t-1)%L], x[t], x[(t+1)%L]  (PyTorch circular pad).
    x_prev = jnp.roll(x, 1, axis=1)
    x_next = jnp.roll(x, -1, axis=1)
    x3 = jnp.concatenate([x_prev, x, x_next], axis=-1)       # (B, L, 3C)
    x3 = x3.reshape(B * L, 3 * C).astype(cdt)                 # DMA moves cdt

    # (D, C, 3) -> (3, C, D) -> (3C, D) so w3[k*C + c, d] == weight[d, c, k],
    # matching the [x_prev | x | x_next] channel order above.
    w3 = jnp.transpose(weight, (2, 1, 0)).reshape(3 * C, D).astype(cdt)

    # --- d_model tiling (only when large; keeps VMEM small, helps 2-TC v7x) ---
    if D >= 1024 and D % 512 == 0:
        TN = 512
    elif D >= 1024 and D % 256 == 0:
        TN = 256
    else:
        TN = D

    # --- row-tile selection with a padding-aware VMEM model --------------------
    def step_bytes(tr):
        inp = 2 * _tile_bytes(tr, 3 * C, cdt)      # double-buffered x3 block
        wgt = 2 * _tile_bytes(3 * C, TN, cdt)      # weight block (resident)
        out = 2 * _tile_bytes(tr, TN, cdt)         # double-buffered output block
        acc = _tile_bytes(tr, TN, jnp.float32)     # in-kernel f32 accumulator
        return inp + wgt + out + acc

    R = B * L
    sub = _sublane(cdt)
    candidates = [d for d in _divisors(R) if d % sub == 0 or d == R]
    fits = [d for d in candidates if step_bytes(d) <= vmem_budget_bytes]
    if fits:
        def score(d):
            steps = R // d
            # Nearest to target_rows; prefer an even step count (TC balance),
            # then the larger tile.
            return (abs(d - target_rows),
                    0 if (steps == 1 or steps % 2 == 0) else 1,
                    -d)
        TR = min(fits, key=score)
        Rp = R
    else:
        # Rare fallback (no sublane-aligned divisor fits the budget): pad rows
        # and slice at the end.
        # TODO(synk): tile D harder instead of row-padding for extreme shapes.
        TR = sub
        while step_bytes(TR + sub) <= vmem_budget_bytes:
            TR += sub
        Rp = _round_up(R, TR)
        x3 = jnp.pad(x3, ((0, Rp - R), (0, 0)))

    grid = (Rp // TR, D // TN)
    out = pl.pallas_call(
        _token_embedding_kernel,
        out_shape=jax.ShapeDtypeStruct((Rp, D), cdt),
        grid_spec=pltpu.PrefetchScalarGridSpec(
            num_scalar_prefetch=0,
            grid=grid,
            in_specs=[
                # Row block is constant across the (inner) N axis -> no re-DMA.
                pl.BlockSpec((TR, 3 * C), lambda i, j: (i, 0)),
                # Weight tile is constant across the row axis -> stays resident.
                pl.BlockSpec((3 * C, TN), lambda i, j: (0, j)),
            ],
            out_specs=pl.BlockSpec((TR, TN), lambda i, j: (i, j)),
        ),
        compiler_params=pltpu.CompilerParams(
            dimension_semantics=("parallel", "parallel"),
            vmem_limit_bytes=vmem_limit_bytes,
        ),
    )(x3, w3)

    if Rp != R:
        out = out[:R]
    return out.reshape(B, L, D)


def ref_token_embedding(x, weight):
    """Pure-JAX reference: explicit circular pad + per-tap einsum (float32)."""
    B, L, C = x.shape
    D = weight.shape[0]
    xp = jnp.pad(x.astype(jnp.float32), ((0, 0), (1, 1), (0, 0)), mode="wrap")
    out = jnp.zeros((B, L, D), jnp.float32)
    for k in range(3):
        out = out + jnp.einsum("blc,dc->bld", xp[:, k:k + L, :],
                               weight[:, :, k].astype(jnp.float32))
    return out


if __name__ == "__main__":
    B, L, C, D = 2, 8, 4, 32  # batch, seq_len, c_in, d_model
    key = jax.random.PRNGKey(0)
    kx, kw = jax.random.split(key)
    x = jax.random.normal(kx, (B, L, C), jnp.float32)

    # Deterministic Kaiming-normal init (mode='fan_in', nonlinearity='leaky_relu',
    # default negative_slope=0.01) for Conv1d weight of shape (d_model, c_in, 3).
    fan_in = C * 3
    gain = math.sqrt(2.0 / (1.0 + 0.01 ** 2))
    std = gain / math.sqrt(fan_in)
    weight = std * jax.random.normal(kw, (D, C, 3), jnp.float32)

    ref = ref_token_embedding(x, weight)

    # f32 path (tolerance covers MXU multi-pass rounding on f32 operands).
    out = jax.block_until_ready(token_embedding(x, weight))
    assert out.shape == (B, L, D)
    if not jnp.allclose(out, ref, atol=2e-2, rtol=2e-2):
        raise AssertionError("Pallas kernel (f32) output mismatch vs reference")

    # bf16 operand + bf16 store path (f32 accumulation) -- loose tolerance.
    out_bf16 = jax.block_until_ready(
        token_embedding(x, weight, compute_dtype=jnp.bfloat16))
    assert out_bf16.dtype == jnp.bfloat16
    if not jnp.allclose(out_bf16.astype(jnp.float32), ref, atol=1e-1, rtol=5e-2):
        raise AssertionError("Pallas kernel (bf16) output mismatch vs reference")

    print("KERNEL_OK")
</pallas_src>

<mosaic_0001>
module attributes {stable_mosaic.version = 11 : i64} {
  func.func @_token_embedding_kernel(%arg0: i32, %arg1: i32, %arg2: memref<16x12xf32, #tpu.memory_space<vmem>>, %arg3: memref<12x32xf32, #tpu.memory_space<vmem>>, %arg4: memref<16x32xf32, #tpu.memory_space<vmem>>) attributes {dimension_semantics = [#tpu.dimension_semantics<parallel>, #tpu.dimension_semantics<parallel>], iteration_bounds = array<i64: 1, 1>, scalar_prefetch = 0 : i64, scratch_operands = 0 : i64, tpu.core_type = #tpu.core_type<tc>, window_params = [{transform_indices = @transform_0, window_bounds = array<i64: 16, 12>}, {transform_indices = @transform_1, window_bounds = array<i64: 12, 32>}, {transform_indices = @transform_2, window_bounds = array<i64: 16, 32>}]} {
    %c0 = arith.constant 0 : index
    %c0_0 = arith.constant 0 : index
    %0 = vector.load %arg2[%c0, %c0_0] : memref<16x12xf32, #tpu.memory_space<vmem>>, vector<16x12xf32>
    %c0_1 = arith.constant 0 : index
    %c0_2 = arith.constant 0 : index
    %1 = vector.load %arg3[%c0_1, %c0_2] : memref<12x32xf32, #tpu.memory_space<vmem>>, vector<12x32xf32>
    %cst = arith.constant dense<0.000000e+00> : vector<16x32xf32>
    %2 = tpu.matmul %0, %1, %cst {dimension_numbers = #tpu.dot_dimension_numbers<[1], [0], [0], [1], [0, 0, 1, 1], [], []>} : vector<16x12xf32>, vector<12x32xf32>, vector<16x32xf32> -> vector<16x32xf32>
    %c0_3 = arith.constant 0 : index
    %c0_4 = arith.constant 0 : index
    %3 = vector.load %arg4[%c0_3, %c0_4] : memref<16x32xf32, #tpu.memory_space<vmem>>, vector<16x32xf32>
    tpu.vector_store %arg4[%c0_3, %c0_4], %2 {strides = array<i32>} : memref<16x32xf32, #tpu.memory_space<vmem>>, vector<16x32xf32>,
    return
  }
  func.func @transform_0(%arg0: i32, %arg1: i32) -> (i32, i32) {
    %c0_i32 = arith.constant 0 : i32
    %c0_i32_0 = arith.constant 0 : i32
    return %arg0, %c0_i32 : i32, i32
  }
  func.func @transform_1(%arg0: i32, %arg1: i32) -> (i32, i32) {
    %c0_i32 = arith.constant 0 : i32
    %c0_i32_0 = arith.constant 0 : i32
    return %c0_i32, %arg1 : i32, i32
  }
  func.func @transform_2(%arg0: i32, %arg1: i32) -> (i32, i32) {
    %c0_i32 = arith.constant 0 : i32
    return %arg0, %arg1 : i32, i32
  }
}

</mosaic_0001>

<bundles_post_ra>
// kernel: tpu_custom_call.1
= control target key start
LH: loop header
LB: loop body
LE: loop exit
PB: predicated region body
PF: predicated region fallthrough
CT: control target
= control target key end

     0   :  { %7 = vsyncpa [#allocation3], 0  ;;  %s274_s0 = inlined_call_operand.hbm [shape: f32[16,12], index: 0, kind: input, shape index: {}]   ;;  %s275_s1 = inlined_call_operand.hbm [shape: f32[12,32], index: 1, kind: input, shape index: {}]   ;;  %s276_s2 = inlined_call_operand.hbm [shape: f32[16,32], index: 2, kind: output, shape index: {}]  }
   0x1   :  { %8 = vsyncpa [#allocation6], 0 }
   0x2   :  { %9 = vsyncpa [#allocation4], 0  ;;  %s236_s9 = smov [#allocation2]  }
   0x3   :  { %s15_s10 = sshll.u32 %s236_s9, 4  ;;  %s16_s10 = int_to_ptr.vmem [resolvable:$true] %s15_s10 }
   0x4   :  { %s178_s11 = scalar_lea.vmem %s16_s10, 256  ;;  %p183_p1 = scmp.lt.s32.totalorder %s16_s10, %s16_s10 }
   0x5   :  { %p179_p0 = scmp.ne.s32.totalorder %s16_s10, %s178_s11  ;;  %p184_p2 = scmp.lt.s32.totalorder %s178_s11, %s178_s11 }
   0x7   :  { %p185_p3 = por %p184_p2, %p183_p1 }
   0x9   :  { %p186_p4 = pnand %p185_p3, %p179_p0 }
   0xb   :  { %189 = shalt.err (!%p186_p4)
}
   0xc   :  { %s237_s12 = smov 128   ;;  %s238_s13 = smov 8  }
   0xd   :  { %21 = dma.hbm_to_vmem [thread:$0]  %s274_s0, 256, %s16_s10, [#allocation3], %s237_s12, %s237_s12, %s238_s13  }
   0xe   :  { %s239_s16 = smov [#allocation5]  }
   0xf   :  { %s27_s17 = sshll.u32 %s239_s16, 4  ;;  %s28_s17 = int_to_ptr.vmem [resolvable:$true] %s27_s17 }
  0x10   :  { %s198_s18 = scalar_lea.vmem %s28_s17, 256  ;;  %p203_p6 = scmp.lt.s32.totalorder %s28_s17, %s28_s17 }
  0x11   :  { %p199_p5 = scmp.ne.s32.totalorder %s28_s17, %s198_s18  ;;  %p204_p7 = scmp.lt.s32.totalorder %s198_s18, %s198_s18 }
  0x13   :  { %p205_p8 = por %p204_p7, %p203_p6 }
  0x15   :  { %p206_p9 = pnand %p205_p8, %p199_p5 }
  0x17   :  { %209 = shalt.err (!%p206_p9)
}
  0x18   :  { %33 = dma.hbm_to_vmem [thread:$0]  %s275_s1, 256, %s28_s17, [#allocation6], %s237_s12, %s237_s12, %s238_s13  }
  0x19   :  { %230 = dma.done.wait [#allocation3], 256  }
  0x1a   :  { %231 = vsyncadd [#allocation3], 4294967040 }
  0x1b   :  { %232 = dma.done.wait [#allocation6], 256  }
  0x1c   :  { %233 = vsyncadd [#allocation6], 4294967040  ;;  %vm51_vm0 = vcmask 1043456   ;;  %vm44_vm1 = vcmask 97280   ;;  %v43_v0 = vld [vmem:[#allocation5 + $0x8] sm:$0xf] }
  0x1d   :  { %v42_v1 = vld [vmem:[#allocation5] sm:$0xff]  ;;  %v40_v2 = vld [vmem:[#allocation2] sm:$0xff]  ;;  %158 = vmatprep.subr.msk.mxu0 %vm51_vm0, %v43_v0  ;;  %v41_v3 = vld [vmem:[#allocation2 + $0x8] sm:$0xff]  ;;  %vm130_vm2 = vcmask 261120   ;;  %s240_s0 = smov [#allocation7]  }
  0x1e   :  { %162 = vmatprep.mubr.msk.f32.mxu0 %vm44_vm1, %v40_v2  ;;  %159 = vmatpush3.msk.msra.mxu0 %vm51_vm0, %v43_v0  ;;  %s138_s21 = sshll.u32 %s240_s0, 4  ;;  %s139_s21 = int_to_ptr.vmem [resolvable:$true] %s138_s21 }
  0x1f   :  { %160 = vmatprep.subr.mxu0 %v42_v1  ;;  %s210_s1 = scalar_lea.vmem %s139_s21, 256  ;;  %p215_p11 = scmp.lt.s32.totalorder %s139_s21, %s139_s21 }
  0x20   :  { %161 = vmatpush3.msra.mxu0 %v42_v1  ;;  %p211_p10 = scmp.ne.s32.totalorder %s139_s21, %s210_s1  ;;  %p216_p12 = scmp.lt.s32.totalorder %s210_s1, %s210_s1 }
  0x21   :  { %163 = vmatmul.mubr.msk.f32.vlgmr.msra.gmra.mxu0 %vm44_vm1, %v41_v3 }
  0x22   :  { %p217_p13 = por %p216_p12, %p215_p11 }
  0x24   :  { %p218_p0 = pnand %p217_p13, %p211_p10 }
  0xe1   :  { %v164_v4 = vpop.f32.mrf.mxu0 }
  0xe2   :  { %132 = vst.msk [vmem:[#allocation7 + $0x8] sm:$0xff] %vm130_vm2, %v164_v4 }
  0xe3   :  { %v121_v5 = vpop.f32.mrf.mxu0 }
  0xe4   :  { %131 = vst.msk [vmem:[#allocation7] sm:$0xff] %vm130_vm2, %v121_v5 }
  0xe5   :  { %221 = shalt.err (!%p218_p0)
}
  0xe6   :  { %144 = dma.vmem_to_hbm [thread:$0]  %s139_s21, 256, %s276_s2, [#allocation4], %s237_s12, %s237_s12, %s238_s13  }
  0xe7   :  { %234 = dma.done.wait [#allocation4], 256  }
  0xe8   :  { %235 = vsyncadd [#allocation4], 4294967040 }
  0xe9   :  { %148 = vsyncpa [#allocation3], 1 }
  0xea   :  { %149 = vsyncpa [#allocation6], 1 }
  0xeb   :  { %150 = vsyncpa [#allocation4], 1 }

</bundles_post_ra>
